<compile_context>
chip_gen: v6e
topology: v6e:2x2x1
jax: 0.10.0
libtpu: 0.0.40
codegen_flags: <defaults>
</compile_context>

<pallas_src>
import math

import jax
import jax.numpy as jnp
from jax import lax
from jax.experimental import pallas as pl
from jax.experimental.pallas import tpu as pltpu

SQRT_HALF = math.sqrt(0.5)
MASK_BIAS = -1e30  # finite "-inf": keeps fully-padded rows NaN-free


def _round_up(x, m):
    return (x + m - 1) // m * m


def _pick_block_t(total, preferred):
    """Largest multiple of 128 that divides `total` and is <= preferred."""
    bt = max(128, min(total, preferred) // 128 * 128)
    while total % bt:
        bt -= 128
    return bt


def _attention_kernel(conved_ref, embedded_ref, enc_conved_ref,
                      enc_combined_ref, bias_ref, w_in_ref, b_in_ref,
                      w_out_ref, b_out_ref, out_comb_ref, out_attn_ref):
    conved_ct = conved_ref[0]           # (C, tT) channel-major, original dtype
    embedded = embedded_ref[0]          # (tT, E)
    enc_conved = enc_conved_ref[0]      # (S, E)
    enc_combined = enc_combined_ref[0]  # (S, E)
    bias = bias_ref[0]                  # (1, S) f32 additive padding bias

    # linear_in(conved.permute(0,2,1)) -> (tT, E).
    # Single small XLU transpose of the conved tile; the matmul itself is the
    # MXU-native "NT" contraction over the channel axis (no operand copies).
    conved_tc = conved_ct.T                                   # (tT, C)
    conved_emb = lax.dot_general(
        conved_tc, w_in_ref[...], (((1,), (1,)), ((), ())),
        preferred_element_type=jnp.float32) + b_in_ref[...]   # (tT, E) f32
    combined = (conved_emb + embedded) * SQRT_HALF            # (tT, E) f32

    # energy = combined @ encoder_conved^T, expressed as a contraction over E
    # (transposed RHS handled natively by the MXU, nothing materialized).
    energy = lax.dot_general(
        combined.astype(enc_conved.dtype), enc_conved,
        (((1,), (1,)), ((), ())),
        preferred_element_type=jnp.float32)                   # (tT, S) f32
    energy = energy + bias                                    # masked_fill

    # Softmax over the source axis.
    e_max = jnp.max(energy, axis=-1, keepdims=True)
    p = jnp.exp(energy - e_max)
    denom = jnp.sum(p, axis=-1, keepdims=True)
    # EUP approximate reciprocal + one Newton refinement (tiny (tT,1) column):
    # keeps the divide off the VALU while staying ~f32 accurate.
    r = pl.reciprocal(denom, approx=True)
    r = r * (2.0 - denom * r)
    attention = p * r                                         # (tT, S) f32
    out_attn_ref[0] = attention.astype(out_attn_ref.dtype)

    # attended_encoding = attention @ encoder_combined -> (tT, E)
    attended = jnp.dot(attention.astype(enc_combined.dtype), enc_combined,
                       preferred_element_type=jnp.float32)

    # linear_out, produced directly in channel-major (C, tT) layout by
    # contracting the E axis of W_out against the E axis of attended.
    out_ct = lax.dot_general(
        w_out_ref[...], attended.astype(w_out_ref.dtype),
        (((1,), (1,)), ((), ())),
        preferred_element_type=jnp.float32) + b_out_ref[...]  # (C, tT) f32
    out_comb_ref[0] = ((conved_ct + out_ct) * SQRT_HALF).astype(
        out_comb_ref.dtype)


def attention_forward(conved, embedded, encoder_conved, encoder_combined,
                      encoder_padding_mask, w_in, b_in, w_out, b_out,
                      *, block_t=512):
    """Matches Attention.forward.

    Args:
      conved:                (B, C, T)
      embedded:              (B, T, E)
      encoder_conved:        (B, S, E)
      encoder_combined:      (B, S, E)
      encoder_padding_mask:  (B, S) bool/int (True == pad)
      w_in:  (E, C) linear_in weight (PyTorch out-in order), b_in: (E,)
      w_out: (C, E) linear_out weight,                      b_out: (C,)
    Returns:
      attended_combined: (B, C, T) in conved.dtype, attention: (B, T, S) f32
    """
    B, C, T = conved.shape
    _, S, E = encoder_conved.shape

    # Lane-align the output-critical dims: T is the lane dim of the (B, C, T)
    # output (and the M dim of every matmul); S is the lane dim of the
    # attention output. Padding them to 128 keeps every store unmasked.
    # No-ops when the model dims are already 128-aligned.
    T_p = _round_up(T, 128)
    S_p = _round_up(S, 128)

    if T_p != T:
        conved = jnp.pad(conved, ((0, 0), (0, 0), (0, T_p - T)))
        embedded = jnp.pad(embedded, ((0, 0), (0, T_p - T), (0, 0)))
    if S_p != S:
        encoder_conved = jnp.pad(encoder_conved,
                                 ((0, 0), (0, S_p - S), (0, 0)))
        encoder_combined = jnp.pad(encoder_combined,
                                   ((0, 0), (0, S_p - S), (0, 0)))

    # Additive softmax bias: -1e30 on padded source positions (including the
    # S-padding we just added), 0 elsewhere.
    mask_f = encoder_padding_mask.astype(jnp.float32)
    if S_p != S:
        mask_f = jnp.pad(mask_f, ((0, 0), (0, S_p - S)), constant_values=1.0)
    bias = (mask_f * jnp.float32(MASK_BIAS)).reshape(B, 1, S_p)

    # Weights stay in PyTorch layout (no wrapper transposes needed).
    b_in2 = b_in.reshape(1, E)
    b_out2 = b_out.reshape(C, 1)

    tT = _pick_block_t(T_p, block_t)
    grid = (B, T_p // tT)

    grid_spec = pltpu.PrefetchScalarGridSpec(
        num_scalar_prefetch=0,
        grid=grid,
        in_specs=[
            pl.BlockSpec((1, C, tT), lambda b, t: (b, 0, t)),    # conved (C,T)
            pl.BlockSpec((1, tT, E), lambda b, t: (b, t, 0)),    # embedded
            pl.BlockSpec((1, S_p, E), lambda b, t: (b, 0, 0)),   # enc_conved
            pl.BlockSpec((1, S_p, E), lambda b, t: (b, 0, 0)),   # enc_combined
            pl.BlockSpec((1, 1, S_p), lambda b, t: (b, 0, 0)),   # mask bias
            pl.BlockSpec((E, C), lambda b, t: (0, 0)),           # W_in (E, C)
            pl.BlockSpec((1, E), lambda b, t: (0, 0)),           # b_in
            pl.BlockSpec((C, E), lambda b, t: (0, 0)),           # W_out (C, E)
            pl.BlockSpec((C, 1), lambda b, t: (0, 0)),           # b_out
        ],
        out_specs=[
            pl.BlockSpec((1, C, tT), lambda b, t: (b, 0, t)),    # combined out
            pl.BlockSpec((1, tT, S_p), lambda b, t: (b, t, 0)),  # attention
        ],
    )

    out_comb, attn = pl.pallas_call(
        _attention_kernel,
        grid_spec=grid_spec,
        out_shape=(jax.ShapeDtypeStruct((B, C, T_p), conved.dtype),
                   jax.ShapeDtypeStruct((B, T_p, S_p), jnp.float32)),
        compiler_params=pltpu.CompilerParams(
            dimension_semantics=("parallel", "parallel"),
            # Explicit budget that still leaves headroom on v7x (64 MiB VMEM).
            vmem_limit_bytes=48 * 1024 * 1024),
    )(conved, embedded, encoder_conved, encoder_combined, bias,
      w_in, b_in2, w_out, b_out2)

    # Slice the alignment padding back off (no-ops when already aligned).
    return out_comb[:, :, :T], attn[:, :T, :S]


def _reference(conved, embedded, encoder_conved, encoder_combined,
               encoder_padding_mask, w_in, b_in, w_out, b_out):
    conved_emb = jnp.einsum('bct,ec->bte', conved, w_in) + b_in
    combined = (conved_emb + embedded) * SQRT_HALF
    energy = jnp.einsum('bte,bse->bts', combined, encoder_conved)
    energy = jnp.where(encoder_padding_mask[:, None, :], -jnp.inf, energy)
    attention = jax.nn.softmax(energy, axis=2)
    attended = jnp.einsum('bts,bse->bte', attention, encoder_combined)
    attended = jnp.einsum('bte,ce->btc', attended, w_out) + b_out
    attended_combined = (conved + jnp.transpose(attended, (0, 2, 1))) * SQRT_HALF
    return attended_combined, attention


if __name__ == "__main__":
    B, C, E, T, S = 2, 8, 32, 8, 16

    key = jax.random.PRNGKey(0)
    ks = jax.random.split(key, 8)
    conved = jax.random.normal(ks[0], (B, C, T), dtype=jnp.float32)
    embedded = jax.random.normal(ks[1], (B, T, E), dtype=jnp.float32)
    encoder_conved = jax.random.normal(ks[2], (B, S, E), dtype=jnp.float32)
    encoder_combined = jax.random.normal(ks[3], (B, S, E), dtype=jnp.float32)

    # Deterministic padding mask: batch 0 has no padding, batch 1 pads tail.
    src_lengths = jnp.array([S, S - 4], dtype=jnp.int32)
    encoder_padding_mask = (jnp.arange(S)[None, :] >= src_lengths[:, None])

    # Deterministic parameter init (nn.Linear-like uniform bounds).
    lim_in = 1.0 / math.sqrt(C)
    lim_out = 1.0 / math.sqrt(E)
    w_in = jax.random.uniform(ks[4], (E, C), jnp.float32, -lim_in, lim_in)
    b_in = jax.random.uniform(ks[5], (E,), jnp.float32, -lim_in, lim_in)
    w_out = jax.random.uniform(ks[6], (C, E), jnp.float32, -lim_out, lim_out)
    b_out = jax.random.uniform(ks[7], (C,), jnp.float32, -lim_out, lim_out)

    attended_combined, attention = jax.block_until_ready(
        attention_forward(conved, embedded, encoder_conved, encoder_combined,
                          encoder_padding_mask, w_in, b_in, w_out, b_out))

    ref_comb, ref_attn = _reference(conved, embedded, encoder_conved,
                                    encoder_combined, encoder_padding_mask,
                                    w_in, b_in, w_out, b_out)

    assert attended_combined.shape == (B, C, T)
    assert attention.shape == (B, T, S)
    # Slightly looser than bit-exact because the softmax denominator uses the
    # EUP approximate reciprocal (refined by one Newton step).
    assert jnp.allclose(attended_combined, ref_comb, atol=1e-4, rtol=1e-4)
    assert jnp.allclose(attention, ref_attn, atol=1e-4, rtol=1e-4)

    print("KERNEL_OK")
</pallas_src>

<mosaic_0001>
module attributes {stable_mosaic.version = 11 : i64} {
  func.func @_attention_kernel(%arg0: i32, %arg1: i32, %arg2: memref<1x8x128xf32, #tpu.memory_space<vmem>>, %arg3: memref<1x128x32xf32, #tpu.memory_space<vmem>>, %arg4: memref<1x128x32xf32, #tpu.memory_space<vmem>>, %arg5: memref<1x128x32xf32, #tpu.memory_space<vmem>>, %arg6: memref<1x1x128xf32, #tpu.memory_space<vmem>>, %arg7: memref<32x8xf32, #tpu.memory_space<vmem>>, %arg8: memref<1x32xf32, #tpu.memory_space<vmem>>, %arg9: memref<8x32xf32, #tpu.memory_space<vmem>>, %arg10: memref<8x1xf32, #tpu.memory_space<vmem>>, %arg11: memref<1x8x128xf32, #tpu.memory_space<vmem>>, %arg12: memref<1x128x128xf32, #tpu.memory_space<vmem>>) attributes {dimension_semantics = [#tpu.dimension_semantics<parallel>, #tpu.dimension_semantics<parallel>], iteration_bounds = array<i64: 2, 1>, scalar_prefetch = 0 : i64, scratch_operands = 0 : i64, tpu.core_type = #tpu.core_type<tc>, window_params = [{transform_indices = @transform_0, window_bounds = array<i64: 1, 8, 128>}, {transform_indices = @transform_1, window_bounds = array<i64: 1, 128, 32>}, {transform_indices = @transform_2, window_bounds = array<i64: 1, 128, 32>}, {transform_indices = @transform_3, window_bounds = array<i64: 1, 128, 32>}, {transform_indices = @transform_4, window_bounds = array<i64: 1, 1, 128>}, {pipeline_mode = #tpu.pipeline_mode<synchronous>, transform_indices = @transform_5, window_bounds = array<i64: 32, 8>}, {pipeline_mode = #tpu.pipeline_mode<synchronous>, transform_indices = @transform_6, window_bounds = array<i64: 1, 32>}, {pipeline_mode = #tpu.pipeline_mode<synchronous>, transform_indices = @transform_7, window_bounds = array<i64: 8, 32>}, {pipeline_mode = #tpu.pipeline_mode<synchronous>, transform_indices = @transform_8, window_bounds = array<i64: 8, 1>}, {transform_indices = @transform_9, window_bounds = array<i64: 1, 8, 128>}, {transform_indices = @transform_10, window_bounds = array<i64: 1, 128, 128>}]} {
    %c0 = arith.constant 0 : index
    %c0_0 = arith.constant 0 : index
    %c0_1 = arith.constant 0 : index
    %0 = vector.load %arg2[%c0, %c0_0, %c0_1] : memref<1x8x128xf32, #tpu.memory_space<vmem>>, vector<1x8x128xf32>
    %1 = vector.shape_cast %0 : vector<1x8x128xf32> to vector<8x128xf32>
    %c0_2 = arith.constant 0 : index
    %c0_3 = arith.constant 0 : index
    %c0_4 = arith.constant 0 : index
    %2 = vector.load %arg3[%c0_2, %c0_3, %c0_4] : memref<1x128x32xf32, #tpu.memory_space<vmem>>, vector<1x128x32xf32>
    %3 = vector.shape_cast %2 : vector<1x128x32xf32> to vector<128x32xf32>
    %c0_5 = arith.constant 0 : index
    %c0_6 = arith.constant 0 : index
    %c0_7 = arith.constant 0 : index
    %4 = vector.load %arg4[%c0_5, %c0_6, %c0_7] : memref<1x128x32xf32, #tpu.memory_space<vmem>>, vector<1x128x32xf32>
    %5 = vector.shape_cast %4 : vector<1x128x32xf32> to vector<128x32xf32>
    %c0_8 = arith.constant 0 : index
    %c0_9 = arith.constant 0 : index
    %c0_10 = arith.constant 0 : index
    %6 = vector.load %arg5[%c0_8, %c0_9, %c0_10] : memref<1x128x32xf32, #tpu.memory_space<vmem>>, vector<1x128x32xf32>
    %7 = vector.shape_cast %6 : vector<1x128x32xf32> to vector<128x32xf32>
    %c0_11 = arith.constant 0 : index
    %c0_12 = arith.constant 0 : index
    %c0_13 = arith.constant 0 : index
    %8 = vector.load %arg6[%c0_11, %c0_12, %c0_13] : memref<1x1x128xf32, #tpu.memory_space<vmem>>, vector<1x1x128xf32>
    %9 = vector.shape_cast %8 : vector<1x1x128xf32> to vector<1x128xf32>
    %10 = tpu.transpose %1, [1, 0] : vector<8x128xf32> -> vector<128x8xf32>
    %c0_14 = arith.constant 0 : index
    %c0_15 = arith.constant 0 : index
    %11 = vector.load %arg7[%c0_14, %c0_15] : memref<32x8xf32, #tpu.memory_space<vmem>>, vector<32x8xf32>
    %cst = arith.constant dense<0.000000e+00> : vector<128x32xf32>
    %12 = tpu.matmul %10, %11, %cst {dimension_numbers = #tpu.dot_dimension_numbers<[1], [1], [0], [0], [0, 0, 1, 0], [], []>} : vector<128x8xf32>, vector<32x8xf32>, vector<128x32xf32> -> vector<128x32xf32>
    %c0_16 = arith.constant 0 : index
    %c0_17 = arith.constant 0 : index
    %13 = vector.load %arg8[%c0_16, %c0_17] : memref<1x32xf32, #tpu.memory_space<vmem>>, vector<1x32xf32>
    %14 = vector.broadcast %13 : vector<1x32xf32> to vector<128x32xf32>
    %15 = arith.addf %12, %14 : vector<128x32xf32>
    %16 = arith.addf %15, %3 : vector<128x32xf32>
    %cst_18 = arith.constant 0.707106769 : f32
    %17 = vector.broadcast %cst_18 : f32 to vector<128x32xf32>
    %18 = arith.mulf %16, %17 : vector<128x32xf32>
    %cst_19 = arith.constant dense<0.000000e+00> : vector<128x128xf32>
    %19 = tpu.matmul %18, %5, %cst_19 {dimension_numbers = #tpu.dot_dimension_numbers<[1], [1], [0], [0], [0, 0, 1, 0], [], []>} : vector<128x32xf32>, vector<128x32xf32>, vector<128x128xf32> -> vector<128x128xf32>
    %20 = vector.broadcast %9 : vector<1x128xf32> to vector<128x128xf32>
    %21 = arith.addf %19, %20 : vector<128x128xf32>
    %cst_20 = arith.constant dense<0xFF800000> : vector<128xf32>
    %22 = vector.multi_reduction <maximumf>, %21, %cst_20 [1] : vector<128x128xf32> to vector<128xf32>
    %23 = vector.shape_cast %22 : vector<128xf32> to vector<128x1xf32>
    %24 = vector.broadcast %23 : vector<128x1xf32> to vector<128x128xf32>
    %25 = arith.subf %21, %24 : vector<128x128xf32>
    %26 = math.exp %25 : vector<128x128xf32>
    %cst_21 = arith.constant dense<0.000000e+00> : vector<128xf32>
    %27 = vector.multi_reduction <add>, %26, %cst_21 [1] : vector<128x128xf32> to vector<128xf32>
    %28 = vector.shape_cast %27 : vector<128xf32> to vector<128x1xf32>
    %29 = tpu.reciprocal %28 {approx = true} : vector<128x1xf32> -> vector<128x1xf32>
    %30 = arith.mulf %28, %29 : vector<128x1xf32>
    %cst_22 = arith.constant 2.000000e+00 : f32
    %31 = vector.broadcast %cst_22 : f32 to vector<128x1xf32>
    %32 = arith.subf %31, %30 : vector<128x1xf32>
    %33 = arith.mulf %29, %32 : vector<128x1xf32>
    %34 = vector.broadcast %33 : vector<128x1xf32> to vector<128x128xf32>
    %35 = arith.mulf %26, %34 : vector<128x128xf32>
    %c0_23 = arith.constant 0 : index
    %c0_24 = arith.constant 0 : index
    %c0_25 = arith.constant 0 : index
    %36 = vector.load %arg12[%c0_23, %c0_24, %c0_25] : memref<1x128x128xf32, #tpu.memory_space<vmem>>, vector<1x128x128xf32>
    %37 = vector.shape_cast %36 : vector<1x128x128xf32> to vector<128x128xf32>
    %38 = vector.shape_cast %35 : vector<128x128xf32> to vector<1x128x128xf32>
    tpu.vector_store %arg12[%c0_23, %c0_24, %c0_25], %38 {strides = array<i32>} : memref<1x128x128xf32, #tpu.memory_space<vmem>>, vector<1x128x128xf32>,
    %cst_26 = arith.constant dense<0.000000e+00> : vector<128x32xf32>
    %39 = tpu.matmul %35, %7, %cst_26 {dimension_numbers = #tpu.dot_dimension_numbers<[1], [0], [0], [1], [0, 0, 1, 1], [], []>} : vector<128x128xf32>, vector<128x32xf32>, vector<128x32xf32> -> vector<128x32xf32>
    %c0_27 = arith.constant 0 : index
    %c0_28 = arith.constant 0 : index
    %40 = vector.load %arg9[%c0_27, %c0_28] : memref<8x32xf32, #tpu.memory_space<vmem>>, vector<8x32xf32>
    %cst_29 = arith.constant dense<0.000000e+00> : vector<8x128xf32>
    %41 = tpu.matmul %40, %39, %cst_29 {dimension_numbers = #tpu.dot_dimension_numbers<[1], [1], [0], [0], [0, 0, 1, 0], [], []>} : vector<8x32xf32>, vector<128x32xf32>, vector<8x128xf32> -> vector<8x128xf32>
    %c0_30 = arith.constant 0 : index
    %c0_31 = arith.constant 0 : index
    %42 = vector.load %arg10[%c0_30, %c0_31] : memref<8x1xf32, #tpu.memory_space<vmem>>, vector<8x1xf32>
    %43 = vector.broadcast %42 : vector<8x1xf32> to vector<8x128xf32>
    %44 = arith.addf %41, %43 : vector<8x128xf32>
    %45 = arith.addf %1, %44 : vector<8x128xf32>
    %cst_32 = arith.constant 0.707106769 : f32
    %46 = vector.broadcast %cst_32 : f32 to vector<8x128xf32>
    %47 = arith.mulf %45, %46 : vector<8x128xf32>
    %c0_33 = arith.constant 0 : index
    %c0_34 = arith.constant 0 : index
    %c0_35 = arith.constant 0 : index
    %48 = vector.load %arg11[%c0_33, %c0_34, %c0_35] : memref<1x8x128xf32, #tpu.memory_space<vmem>>, vector<1x8x128xf32>
    %49 = vector.shape_cast %48 : vector<1x8x128xf32> to vector<8x128xf32>
    %50 = vector.shape_cast %47 : vector<8x128xf32> to vector<1x8x128xf32>
    tpu.vector_store %arg11[%c0_33, %c0_34, %c0_35], %50 {strides = array<i32>} : memref<1x8x128xf32, #tpu.memory_space<vmem>>, vector<1x8x128xf32>,
    return
  }
  func.func @transform_0(%arg0: i32, %arg1: i32) -> (i32, i32, i32) {
    %c0_i32 = arith.constant 0 : i32
    %c0_i32_0 = arith.constant 0 : i32
    return %arg0, %c0_i32, %arg1 : i32, i32, i32
  }
  func.func @transform_1(%arg0: i32, %arg1: i32) -> (i32, i32, i32) {
    %c0_i32 = arith.constant 0 : i32
    %c0_i32_0 = arith.constant 0 : i32
    return %arg0, %arg1, %c0_i32 : i32, i32, i32
  }
  func.func @transform_2(%arg0: i32, %arg1: i32) -> (i32, i32, i32) {
    %c0_i32 = arith.constant 0 : i32
    %c0_i32_0 = arith.constant 0 : i32
    %c0_i32_1 = arith.constant 0 : i32
    return %arg0, %c0_i32, %c0_i32_0 : i32, i32, i32
  }
  func.func @transform_3(%arg0: i32, %arg1: i32) -> (i32, i32, i32) {
    %c0_i32 = arith.constant 0 : i32
    %c0_i32_0 = arith.constant 0 : i32
    %c0_i32_1 = arith.constant 0 : i32
    return %arg0, %c0_i32, %c0_i32_0 : i32, i32, i32
  }
  func.func @transform_4(%arg0: i32, %arg1: i32) -> (i32, i32, i32) {
    %c0_i32 = arith.constant 0 : i32
    %c0_i32_0 = arith.constant 0 : i32
    %c0_i32_1 = arith.constant 0 : i32
    return %arg0, %c0_i32, %c0_i32_0 : i32, i32, i32
  }
  func.func @transform_5(%arg0: i32, %arg1: i32) -> (i32, i32) {
    %c0_i32 = arith.constant 0 : i32
    %c0_i32_0 = arith.constant 0 : i32
    %c0_i32_1 = arith.constant 0 : i32
    return %c0_i32, %c0_i32_0 : i32, i32
  }
  func.func @transform_6(%arg0: i32, %arg1: i32) -> (i32, i32) {
    %c0_i32 = arith.constant 0 : i32
    %c0_i32_0 = arith.constant 0 : i32
    %c0_i32_1 = arith.constant 0 : i32
    return %c0_i32, %c0_i32_0 : i32, i32
  }
  func.func @transform_7(%arg0: i32, %arg1: i32) -> (i32, i32) {
    %c0_i32 = arith.constant 0 : i32
    %c0_i32_0 = arith.constant 0 : i32
    %c0_i32_1 = arith.constant 0 : i32
    return %c0_i32, %c0_i32_0 : i32, i32
  }
  func.func @transform_8(%arg0: i32, %arg1: i32) -> (i32, i32) {
    %c0_i32 = arith.constant 0 : i32
    %c0_i32_0 = arith.constant 0 : i32
    %c0_i32_1 = arith.constant 0 : i32
    return %c0_i32, %c0_i32_0 : i32, i32
  }
  func.func @transform_9(%arg0: i32, %arg1: i32) -> (i32, i32, i32) {
    %c0_i32 = arith.constant 0 : i32
    %c0_i32_0 = arith.constant 0 : i32
    return %arg0, %c0_i32, %arg1 : i32, i32, i32
  }
  func.func @transform_10(%arg0: i32, %arg1: i32) -> (i32, i32, i32) {
    %c0_i32 = arith.constant 0 : i32
    %c0_i32_0 = arith.constant 0 : i32
    return %arg0, %arg1, %c0_i32 : i32, i32, i32
  }
}

</mosaic_0001>

<bundles_post_ra>
// kernel: tpu_custom_call.1
= control target key start
LH: loop header
LB: loop body
LE: loop exit
PB: predicated region body
PF: predicated region fallthrough
CT: control target
= control target key end

     0   :  { %s2894_s0 = inlined_call_operand.vmem [shape: f32[2,8,128], index: 0, kind: input, shape index: {}]   ;;  %s2895_s1 = inlined_call_operand.vmem [shape: f32[2,128,32], index: 1, kind: input, shape index: {}]   ;;  %s2896_s2 = inlined_call_operand.vmem [shape: f32[2,128,32], index: 2, kind: input, shape index: {}]   ;;  %s2897_s3 = inlined_call_operand.vmem [shape: f32[2,128,32], index: 3, kind: input, shape index: {}]   ;;  %s2898_s4 = inlined_call_operand.vmem [shape: f32[2,1,128], index: 4, kind: input, shape index: {}]   ;;  %s2899_s5 = inlined_call_operand.vmem [shape: f32[32,8], index: 5, kind: input, shape index: {}]   ;;  %s2900_s6 = inlined_call_operand.vmem [shape: f32[1,32], index: 6, kind: input, shape index: {}]   ;;  %s2901_s7 = inlined_call_operand.vmem [shape: f32[8,32], index: 7, kind: input, shape index: {}]   ;;  %s2902_s8 = inlined_call_operand.vmem [shape: f32[8,1], index: 8, kind: input, shape index: {}]   ;;  %s2903_s9 = inlined_call_operand.hbm [shape: f32[2,8,128], index: 9, kind: output, shape index: {0}]   ;;  %s2904_s10 = inlined_call_operand.hbm [shape: f32[2,128,128], index: 10, kind: output, shape index: {1}]  }
   0x1   :  { %2905 = sst [smem:[#allocation8_spill]] %s2894_s0 }
   0x2   :  { %2906 = sst [smem:[#allocation9_spill]] %s2895_s1 }
   0x3   :  { %2907 = sst [smem:[#allocation10_spill]] %s2896_s2 }
   0x4   :  { %2908 = sst [smem:[#allocation11_spill]] %s2897_s3 }
   0x5   :  { %2909 = sst [smem:[#allocation12_spill]] %s2898_s4 }
   0x6   :  { %16 = vsyncpa [#allocation3], 0 }
   0x7   :  { %18 = vsyncpa [#allocation3 + $0x1], 0 }
   0x8   :  { %19 = vsyncpa [#allocation5], 0 }
   0x9   :  { %21 = vsyncpa [#allocation5 + $0x1], 0  ;;  %s2420_s13 = smov 0   ;;  %s2422_s14 = smov 0  }
   0xa   :  { %s2424_s15 = smov 0   ;;  %s2426_s16 = smov 0  }
   0xb   :  { %s2428_s17 = smov 0   ;;  %s2430_s18 = smov 0  }
   0xc LB: > { %s1742_s19 = sadd.s32 4294967295, %s2356_s18   ;;  %s1743_s20 = sadd.s32 4294967294, %s2356_s18   ;;  %s2356_s18 = sphi %s2430_s18, %s27_s18   ;;  %s2352_s17 = sphi %s2428_s17, %s2922_s17   ;;  %s2348_s16 = sphi %s2426_s16, %s2921_s16   ;;  %s2344_s15 = sphi %s2424_s15, %s2920_s15   ;;  %s2340_s14 = sphi %s2422_s14, %s2919_s14   ;;  %s2336_s13 = sphi %s2420_s13, %s2918_s13  }
   0xd   : > { %s39_s21 = sadd.s32 1, %s2352_s17  ;;  %s266_s22 = sadd.s32 1, %s2344_s15 }
   0xe   : > { %p41_p0 = scmp.ge.s32.totalorder %s39_s21, 2  ;;  %p276_p1 = scmp.ne.s32.totalorder %s2344_s15, %s2340_s14 }
   0xf   : > { %p277_p2 = scmp.eq.s32.totalorder %s1742_s19, 1  ;;  %p282_p3 = scmp.ne.s32.totalorder %s2340_s14, %s2336_s13 }
  0x10   : > { %s2924_s21 = smov (%p41_p0, %s39_s21), 0  ;;  %p283_p5 = scmp.eq.s32.totalorder %s1743_s20, 1 }
  0x11   : > { %p2460_p4 = por %p277_p2, %p276_p1  ;;  %s261_s24 = ssub.s32 %s2352_s17, %s2924_s21 }
  0x12   : > { %p1746_p6 = scmp.ge.s32.totalorder %s2356_s18, 1  ;;  %p264_p7 = scmp.eq.s32.totalorder %s261_s24, 0 }
  0x13   : > { %p2467_p8 = por %p283_p5, %p282_p3  ;;  %p386_p9 = scmp.lt.s32.totalorder %s2356_s18, 3 }
  0x14   : > { %s2473_s26 = scalar_select %p264_p7, %s2344_s15, %s266_s22  }
  0x15   : > { %p387_p10 = pnand %p1746_p6, %p386_p9 }
  0x16   : > { %p453_p11 = scmp.lt.s32.totalorder (!%p387_p10), %s2348_s16, 1  ;;  %s2912_s0 = sld [smem:[#allocation8_spill]] (!%p387_p10) }
  0x17   : > { %390 = sbr.rel (%p387_p10) target bundleno = 1405 (0x57d), region = 56  ;;  %s2913_s2 = sld [smem:[#allocation10_spill]] (!%p387_p10) }
  0x18   : > { %s2914_s1 = sld [smem:[#allocation9_spill]] (!%p387_p10)  ;;  %s1837_s24 = sshll.u32 (!%p387_p10), %s2348_s16, 11 }
  0x19   : > { %s2915_s4 = sld [smem:[#allocation12_spill]] (!%p387_p10)  ;;  %s2825_s19 = scalar_lea.hbm (!%p387_p10), %s2904_s10, %s1837_s24 }
  0x1a   : > { %s2916_s3 = sld [smem:[#allocation11_spill]] (!%p387_p10) }
  0x1c   : > { %v569_v0 = vld [vmem:[%s2899_s5 + $0x18] sm:$0xff]  ;;  %vm577_vm0 = vcmask 64512   ;;  %v568_v1 = vld [vmem:[%s2899_s5 + $0x10] sm:$0xff]  ;;  %s2484_s11 = scalar_select %p453_p11, %s2348_s16, 1  ;;  %v567_v2 = vld [vmem:[%s2899_s5 + $0x8] sm:$0xff]  ;;  %vm821_vm1 = vcmask 261120  }
  0x1d   : > { %1939 = vmatprep.subr.msk.mxu1 %vm577_vm0, %v569_v0  ;;  %v566_v4 = vld [vmem:[%s2899_s5] sm:$0xff]  ;;  %vm2359_vm2 = vmmov 0  }
  0x1e   : > { %1940 = vmatpush3.xpose.msk.msra.mxu1 %vm577_vm0, %v569_v0  ;;  %s1749_s12 = sshll.u32 %s2484_s11, 3  ;;  %s2507_s30 = sshll.u32 %s2484_s11, 7  ;;  %v2588_v37 = vld [vmem:[%s2900_s6] ss:$0 sm:$0xff] }
  0x1f   : > { %1941 = vmatprep.subr.msk.mxu1 %vm577_vm0, %v568_v1  ;;  %s2495_s27 = scalar_lea.vmem %s2912_s0, %s1749_s12  ;;  %s2513_s20 = scalar_lea.vmem %s2913_s2, %s2507_s30 }
  0x20   : > { %v484_v3 = vld [vmem:[%s2495_s27] sm:$0xff]  ;;  %v516_v5 = vld [vmem:[%s2513_s20 + $0x78] sm:$0xff]  ;;  %v515_v8 = vld [vmem:[%s2513_s20 + $0x70] sm:$0xff]  ;;  %s2583_s28 = scalar_lea.vmem %s2914_s1, %s2507_s30  ;;  %s482_s22 = scalar_lea.vmem %s2915_s4, %s2484_s11 }
  0x21   : > { %534 = vxpose.xlu0.b32.start.end [1/1] (short) %v484_v3, 128  ;;  %v514_v10 = vld [vmem:[%s2513_s20 + $0x68] sm:$0xff]  ;;  %v513_v12 = vld [vmem:[%s2513_s20 + $0x60] sm:$0xff]  ;;  %v512_v14 = vld [vmem:[%s2513_s20 + $0x58] sm:$0xff] }
  0x22   : > { %1942 = vmatpush3.xpose.msk.msra.mxu1 %vm577_vm0, %v568_v1  ;;  %v511_v16 = vld [vmem:[%s2513_s20 + $0x50] sm:$0xff]  ;;  %v510_v18 = vld [vmem:[%s2513_s20 + $0x48] sm:$0xff]  ;;  %v509_v20 = vld [vmem:[%s2513_s20 + $0x40] sm:$0xff] }
  0x23   : > { %1943 = vmatprep.subr.msk.mxu1 %vm577_vm0, %v567_v2  ;;  %v508_v22 = vld [vmem:[%s2513_s20 + $0x38] sm:$0xff]  ;;  %v507_v24 = vld [vmem:[%s2513_s20 + $0x30] sm:$0xff]  ;;  %v506_v26 = vld [vmem:[%s2513_s20 + $0x28] sm:$0xff] }
  0x24   : > { %v505_v28 = vld [vmem:[%s2513_s20 + $0x20] sm:$0xff]  ;;  %v504_v30 = vld [vmem:[%s2513_s20 + $0x18] sm:$0xff]  ;;  %v503_v32 = vld [vmem:[%s2513_s20 + $0x10] sm:$0xff] }
  0x25   : > { %v502_v35 = vld [vmem:[%s2513_s20 + $0x8] sm:$0xff]  ;;  %v501_v36 = vld [vmem:[%s2513_s20] sm:$0xff]  ;;  %v488_v49 = vld [vmem:[%s2583_s28 + $0x18] sm:$0xff] }
  0x26   : > { %1944 = vmatpush3.xpose.msk.msra.mxu1 %vm577_vm0, %v567_v2  ;;  %v486_v39 = vld [vmem:[%s2583_s28 + $0x8] sm:$0xff]  ;;  %v485_v41 = vld [vmem:[%s2583_s28] sm:$0xff]  ;;  %v487_v51 = vld [vmem:[%s2583_s28 + $0x10] sm:$0xff] }
  0x27   : > { %1945 = vmatprep.subr.msk.mxu1 %vm577_vm0, %v566_v4  ;;  %v490_v59 = vld [vmem:[%s2583_s28 + $0x28] sm:$0xff]  ;;  %v489_v61 = vld [vmem:[%s2583_s28 + $0x20] sm:$0xff] }
  0x2a   : > { %1946 = vmatpush3.xpose.msk.msra.mxu1 %vm577_vm0, %v566_v4 }
  0x2b   : > { %1971 = vmatprep.subr.msk.mxu1 %vm821_vm1, %v516_v5 }
  0x9d   : > { %v550_v6 = vpop.trf.xlu0 }
  0x9e   : > { %1947 = vmatprep.mubr.msk.f32.mxu1 %vm577_vm0, %v550_v6 }
  0xa1   : > { %v551_v7 = vpop.trf.xlu0 }
  0xa2   : > { %1948 = vmatmul.mubr.msk.f32.vlgmr.msra.gmra.mxu1 %vm577_vm0, %v551_v7  ;;  %v491_v7 = vld [vmem:[%s2583_s28 + $0x30] sm:$0xff] }
  0xa3   : > { %1972 = vmatpush3.xpose.msk.msra.mxu1 %vm821_vm1, %v516_v5  ;;  %v492_v5 = vld [vmem:[%s2583_s28 + $0x38] sm:$0xff] }
  0xa4   : > { %1973 = vmatprep.subr.msk.mxu1 %vm821_vm1, %v515_v8 }
  0xa5   : > { %v552_v9 = vpop.trf.xlu0 }
  0xa6   : > { %1950 = vmatprep.mubr.msk.f32.mxu1 %vm577_vm0, %v552_v9 }
  0xa7   : > { %1974 = vmatpush3.xpose.msk.msra.mxu1 %vm821_vm1, %v515_v8 }
  0xa8   : > { %1975 = vmatprep.subr.msk.mxu1 %vm821_vm1, %v514_v10 }
  0xa9   : > { %v553_v11 = vpop.trf.xlu0 }
  0xaa   : > { %1951 = vmatmul.mubr.msk.f32.gmra.mxu1 %vm577_vm0, %v553_v11 }
  0xab   : > { %1976 = vmatpush3.xpose.msk.msra.mxu1 %vm821_vm1, %v514_v10 }
  0xac   : > { %1977 = vmatprep.subr.msk.mxu1 %vm821_vm1, %v513_v12 }
  0xad   : > { %v554_v13 = vpop.trf.xlu0 }
  0xae   : > { %1953 = vmatprep.mubr.msk.f32.mxu1 %vm577_vm0, %v554_v13 }
  0xaf   : > { %1978 = vmatpush3.xpose.msk.msra.mxu1 %vm821_vm1, %v513_v12 }
  0xb0   : > { %1979 = vmatprep.subr.msk.mxu1 %vm821_vm1, %v512_v14 }
  0xb1   : > { %v555_v15 = vpop.trf.xlu0 }
  0xb2   : > { %1954 = vmatmul.mubr.msk.f32.gmra.mxu1 %vm577_vm0, %v555_v15  ;;  %v494_v15 = vld [vmem:[%s2583_s28 + $0x48] sm:$0xff] }
  0xb3   : > { %1980 = vmatpush3.xpose.msk.msra.mxu1 %vm821_vm1, %v512_v14 }
  0xb4   : > { %1981 = vmatprep.subr.msk.mxu1 %vm821_vm1, %v511_v16 }
  0xb5   : > { %v556_v17 = vpop.trf.xlu0 }
  0xb6   : > { %1956 = vmatprep.mubr.msk.f32.mxu1 %vm577_vm0, %v556_v17  ;;  %v493_v17 = vld [vmem:[%s2583_s28 + $0x40] sm:$0xff] }
  0xb7   : > { %1982 = vmatpush3.xpose.msk.msra.mxu1 %vm821_vm1, %v511_v16 }
  0xb8   : > { %1983 = vmatprep.subr.msk.mxu1 %vm821_vm1, %v510_v18 }
  0xb9   : > { %v557_v19 = vpop.trf.xlu0 }
  0xba   : > { %1957 = vmatmul.mubr.msk.f32.gmra.mxu1 %vm577_vm0, %v557_v19 }
  0xbb   : > { %1984 = vmatpush3.xpose.msk.msra.mxu1 %vm821_vm1, %v510_v18 }
  0xbc   : > { %1985 = vmatprep.subr.msk.mxu1 %vm821_vm1, %v509_v20 }
  0xbd   : > { %v558_v21 = vpop.trf.xlu0 }
  0xbe   : > { %1959 = vmatprep.mubr.msk.f32.mxu1 %vm577_vm0, %v558_v21 }
  0xbf   : > { %1986 = vmatpush3.xpose.msk.msra.mxu1 %vm821_vm1, %v509_v20 }
  0xc0   : > { %1987 = vmatprep.subr.msk.mxu1 %vm821_vm1, %v508_v22 }
  0xc1   : > { %v559_v23 = vpop.trf.xlu0 }
  0xc2   : > { %1960 = vmatmul.mubr.msk.f32.gmra.mxu1 %vm577_vm0, %v559_v23 }
  0xc3   : > { %1988 = vmatpush3.xpose.msk.msra.mxu1 %vm821_vm1, %v508_v22 }
  0xc4   : > { %1989 = vmatprep.subr.msk.mxu1 %vm821_vm1, %v507_v24 }
  0xc5   : > { %v560_v25 = vpop.trf.xlu0 }
  0xc6   : > { %1962 = vmatprep.mubr.msk.f32.mxu1 %vm577_vm0, %v560_v25  ;;  %v496_v25 = vld [vmem:[%s2583_s28 + $0x58] sm:$0xff] }
  0xc7   : > { %1990 = vmatpush3.xpose.msk.msra.mxu1 %vm821_vm1, %v507_v24 }
  0xc8   : > { %1991 = vmatprep.subr.msk.mxu1 %vm821_vm1, %v506_v26 }
  0xc9   : > { %v561_v27 = vpop.trf.xlu0 }
  0xca   : > { %1963 = vmatmul.mubr.msk.f32.gmra.mxu1 %vm577_vm0, %v561_v27  ;;  %v495_v27 = vld [vmem:[%s2583_s28 + $0x50] sm:$0xff] }
  0xcb   : > { %1992 = vmatpush3.xpose.msk.msra.mxu1 %vm821_vm1, %v506_v26 }
  0xcc   : > { %1993 = vmatprep.subr.msk.mxu1 %vm821_vm1, %v505_v28 }
  0xcd   : > { %v562_v29 = vpop.trf.xlu0 }
  0xce   : > { %1965 = vmatprep.mubr.msk.f32.mxu1 %vm577_vm0, %v562_v29 }
  0xcf   : > { %1994 = vmatpush3.xpose.msk.msra.mxu1 %vm821_vm1, %v505_v28 }
  0xd0   : > { %1995 = vmatprep.subr.msk.mxu1 %vm821_vm1, %v504_v30 }
  0xd1   : > { %v563_v31 = vpop.trf.xlu0 }
  0xd2   : > { %1966 = vmatmul.mubr.msk.f32.gmra.mxu1 %vm577_vm0, %v563_v31 }
  0xd3   : > { %1996 = vmatpush3.xpose.msk.msra.mxu1 %vm821_vm1, %v504_v30 }
  0xd4   : > { %1997 = vmatprep.subr.msk.mxu1 %vm821_vm1, %v503_v32 }
  0xd5   : > { %v564_v33 = vpop.trf.xlu0 }
  0xd6   : > { %1968 = vmatprep.mubr.msk.f32.mxu1 %vm577_vm0, %v564_v33 }
  0xd7   : > { %1998 = vmatpush3.xpose.msk.msra.mxu1 %vm821_vm1, %v503_v32 }
  0xd8   : > { %1999 = vmatprep.subr.msk.mxu1 %vm821_vm1, %v502_v35 }
  0xd9   : > { %v565_v34 = vpop.trf.xlu0 }
  0xda   : > { %1969 = vmatmul.mubr.msk.f32.gmra.mxu1 %vm577_vm0, %v565_v34 }
  0xdb   : > { %2000 = vmatpush3.xpose.msk.msra.mxu1 %vm821_vm1, %v502_v35  ;;  %v498_v35 = vld [vmem:[%s2583_s28 + $0x68] sm:$0xff] }
  0xdc   : > { %2001 = vmatprep.subr.msk.mxu1 %vm821_vm1, %v501_v36 }
  0xdf   : > { %2002 = vmatpush3.xpose.msk.msra.mxu1 %vm821_vm1, %v501_v36 }
 0x162   : > { %v1949_v38 = vpop.f32.mrf.mxu1 }
 0x163   : > { %v710_v40 = vadd.f32 %v1949_v38, %v2588_v37  ;;  %v497_v38 = vld [vmem:[%s2583_s28 + $0x60] sm:$0xff] }
 0x164   : > { %v704_v42 = vpop.f32.mrf.mxu1 }
 0x165   : > { %v705_v43 = vadd.f32 %v2588_v37, %v704_v42  ;;  %v784_v44 = vadd.f32 %v710_v40, %v486_v39 }
 0x167   : > { %v783_v45 = vadd.f32 %v705_v43, %v485_v41  ;;  %v800_v47 = vmul.f32 0.70710677, %v784_v44 }
 0x169   : > { %v799_v46 = vmul.f32 0.70710677, %v783_v45 }
 0x16a   : > { %v1952_v48 = vpop.f32.mrf.mxu1 }
 0x16b   : > { %v720_v50 = vadd.f32 %v1952_v48, %v2588_v37  ;;  %2003 = vmatprep.mubr.msk.f32.mxu1 %vm821_vm1, %v799_v46  ;;  %v500_v46 = vld [vmem:[%s2583_s28 + $0x78] sm:$0xff]  ;;  %v499_v48 = vld [vmem:[%s2583_s28 + $0x70] sm:$0xff]  ;;  %s2682_s28 = scalar_lea.vmem %s2916_s3, %s2507_s30  ;;  %s2761_s30 = sand.u32 1, %s2340_s14  }
 0x16c   : > { %v714_v52 = vpop.f32.mrf.mxu1  ;;  %2004 = vmatmul.mubr.msk.f32.vlgmr.msra.gmra.mxu1 %vm821_vm1, %v800_v47  ;;  %s1748_s29 = sshll.u32 %s2761_s30, 7 }
 0x16d   : > { %v715_v53 = vadd.f32 %v2588_v37, %v714_v52  ;;  %v786_v54 = vadd.f32 %v720_v50, %v488_v49  ;;  %s2765_s12 = scalar_lea.vmem [#allocation4], %s1748_s29 }
 0x16e   : > { %s1582_s20 = sshll.u32 %s2765_s12, 4  ;;  %s2828_s20 = int_to_ptr.vmem [resolvable:$true] %s1582_s20 }
 0x16f   : > { %v785_v55 = vadd.f32 %v715_v53, %v487_v51  ;;  %v802_v57 = vmul.f32 0.70710677, %v786_v54  ;;  %s2250_s1 = scalar_lea.vmem %s2828_s20, 2048 }
 0x170   : > { %p2251_p12 = scmp.ne.s32.totalorder %s2828_s20, %s2250_s1 }
 0x171   : > { %v801_v56 = vmul.f32 0.70710677, %v785_v55  ;;  %v1777_v55 = vld [vmem:[%s482_s22] ss:$0 sm:$0xff]  ;;  %s2361_s22 = smov [#allocation4]  }
 0x172   : > { %v1955_v58 = vpop.f32.mrf.mxu1  ;;  %p2252_p13 = pnand %p2251_p12, %p2460_p4  ;;  %s2254_s11 = sshll.u32 %s2361_s22, 4  ;;  %s2255_s11 = int_to_ptr.vmem [resolvable:$false] %s2254_s11 }
 0x173   : > { %v730_v60 = vadd.f32 %v1955_v58, %v2588_v37  ;;  %2006 = vmatprep.mubr.msk.f32.mxu1 %vm821_vm1, %v801_v56  ;;  %s2256_s2 = scalar_lea.vmem %s2255_s11, 4096  ;;  %p2257_p1 = scmp.lt.s32.totalorder %s2828_s20, %s2255_s11 }
 0x174   : > { %v724_v62 = vpop.f32.mrf.mxu1  ;;  %2007 = vmatmul.mubr.msk.f32.gmra.mxu1 %vm821_vm1, %v802_v57  ;;  %p2253_p0 = pneg %p2252_p13  ;;  %p2258_p2 = scmp.lt.s32.totalorder %s2256_s2, %s2250_s1 }
 0x175   : > { %v725_v63 = vadd.f32 %v2588_v37, %v724_v62  ;;  %v788_v0 = vadd.f32 %v730_v60, %v490_v59 }
 0x176   : > { %p2259_p3 = por %p2258_p2, %p2257_p1 }
 0x177   : > { %v787_v1 = vadd.f32 %v725_v63, %v489_v61  ;;  %v804_v3 = vmul.f32 0.70710677, %v788_v0 }
 0x178   : > { %p2260_p5 = pnand %p2259_p3, %p2253_p0 }
 0x179   : > { %v803_v2 = vmul.f32 0.70710677, %v787_v1 }
 0x17a   : > { %v1958_v4 = vpop.f32.mrf.mxu1 }
 0x17b   : > { %v740_v6 = vadd.f32 %v1958_v4, %v2588_v37  ;;  %2009 = vmatprep.mubr.msk.f32.mxu1 %vm821_vm1, %v803_v2 }
 0x17c   : > { %v734_v8 = vpop.f32.mrf.mxu1  ;;  %2010 = vmatmul.mubr.msk.f32.gmra.mxu1 %vm821_vm1, %v804_v3 }
 0x17d   : > { %v735_v9 = vadd.f32 %v2588_v37, %v734_v8  ;;  %v790_v10 = vadd.f32 %v740_v6, %v492_v5 }
 0x17f   : > { %v789_v11 = vadd.f32 %v735_v9, %v491_v7  ;;  %v806_v13 = vmul.f32 0.70710677, %v790_v10 }
 0x181   : > { %v805_v12 = vmul.f32 0.70710677, %v789_v11 }
 0x182   : > { %v1961_v14 = vpop.f32.mrf.mxu1 }
 0x183   : > { %v750_v16 = vadd.f32 %v1961_v14, %v2588_v37  ;;  %2012 = vmatprep.mubr.msk.f32.mxu1 %vm821_vm1, %v805_v12 }
 0x184   : > { %v744_v18 = vpop.f32.mrf.mxu1  ;;  %2013 = vmatmul.mubr.msk.f32.gmra.mxu1 %vm821_vm1, %v806_v13 }
 0x185   : > { %v745_v19 = vadd.f32 %v2588_v37, %v744_v18  ;;  %v792_v20 = vadd.f32 %v750_v16, %v494_v15 }
 0x187   : > { %v791_v21 = vadd.f32 %v745_v19, %v493_v17  ;;  %v808_v23 = vmul.f32 0.70710677, %v792_v20 }
 0x189   : > { %v807_v22 = vmul.f32 0.70710677, %v791_v21 }
 0x18a   : > { %v1964_v24 = vpop.f32.mrf.mxu1 }
 0x18b   : > { %v760_v26 = vadd.f32 %v1964_v24, %v2588_v37  ;;  %2015 = vmatprep.mubr.msk.f32.mxu1 %vm821_vm1, %v807_v22  ;;  %v531_v24 = vld [vmem:[%s2682_s28 + $0x70] sm:$0xff] }
 0x18c   : > { %v754_v28 = vpop.f32.mrf.mxu1  ;;  %2016 = vmatmul.mubr.msk.f32.gmra.mxu1 %vm821_vm1, %v808_v23  ;;  %v532_v23 = vld [vmem:[%s2682_s28 + $0x78] sm:$0xff] }
 0x18d   : > { %v755_v29 = vadd.f32 %v2588_v37, %v754_v28  ;;  %v794_v30 = vadd.f32 %v760_v26, %v496_v25  ;;  %2027 = vmatprep.subr.mxu0 %v532_v23  ;;  %v530_v25 = vld [vmem:[%s2682_s28 + $0x68] sm:$0xff] }
 0x18e   : > { %2028 = vmatpush3.msra.mxu0 %v532_v23  ;;  %v519_v23 = vld [vmem:[%s2682_s28 + $0x10] sm:$0xff] }
 0x18f   : > { %v793_v31 = vadd.f32 %v755_v29, %v495_v27  ;;  %v810_v33 = vmul.f32 0.70710677, %v794_v30  ;;  %2029 = vmatprep.subr.mxu0 %v531_v24 }
 0x190   : > { %2030 = vmatpush3.msra.mxu0 %v531_v24 }
 0x191   : > { %v809_v32 = vmul.f32 0.70710677, %v793_v31  ;;  %2031 = vmatprep.subr.mxu0 %v530_v25 }
 0x192   : > { %v1967_v34 = vpop.f32.mrf.mxu1  ;;  %2032 = vmatpush3.msra.mxu0 %v530_v25  ;;  %v518_v25 = vld [vmem:[%s2682_s28 + $0x8] sm:$0xff] }
 0x193   : > { %v770_v36 = vadd.f32 %v1967_v34, %v2588_v37  ;;  %2018 = vmatprep.mubr.msk.f32.mxu1 %vm821_vm1, %v809_v32 }
 0x194   : > { %v764_v39 = vpop.f32.mrf.mxu1  ;;  %2019 = vmatmul.mubr.msk.f32.gmra.mxu1 %vm821_vm1, %v810_v33 }
 0x195   : > { %v765_v40 = vadd.f32 %v2588_v37, %v764_v39  ;;  %v796_v41 = vadd.f32 %v770_v36, %v498_v35 }
 0x197   : > { %v795_v42 = vadd.f32 %v765_v40, %v497_v38  ;;  %v812_v44 = vmul.f32 0.70710677, %v796_v41 }
 0x199   : > { %v811_v43 = vmul.f32 0.70710677, %v795_v42 }
 0x19a   : > { %v1970_v45 = vpop.f32.mrf.mxu1 }
 0x19b   : > { %v780_v47 = vadd.f32 %v1970_v45, %v2588_v37  ;;  %2021 = vmatprep.mubr.msk.f32.mxu1 %vm821_vm1, %v811_v43 }
 0x19c   : > { %v774_v49 = vpop.f32.mrf.mxu1  ;;  %2022 = vmatmul.mubr.msk.f32.gmra.mxu1 %vm821_vm1, %v812_v44 }
 0x19d   : > { %v775_v50 = vadd.f32 %v2588_v37, %v774_v49  ;;  %v798_v51 = vadd.f32 %v780_v47, %v500_v46 }
 0x19f   : > { %v797_v52 = vadd.f32 %v775_v50, %v499_v48  ;;  %v814_v54 = vmul.f32 0.70710677, %v798_v51 }
 0x1a1   : > { %v813_v53 = vmul.f32 0.70710677, %v797_v52 }
 0x1a3   : > { %2024 = vmatprep.mubr.msk.f32.mxu1 %vm821_vm1, %v813_v53  ;;  %v529_v53 = vld [vmem:[%s2682_s28 + $0x60] sm:$0xff] }
 0x1a4   : > { %2025 = vmatmul.mubr.msk.f32.gmra.mxu1 %vm821_vm1, %v814_v54  ;;  %2033 = vmatprep.subr.mxu0 %v529_v53 }
 0x1a5   : > { %2034 = vmatpush3.msra.mxu0 %v529_v53 }
 0x22c   : > { %v2005_v56 = vpop.f32.mrf.mxu1 }
 0x22d   : > { %v990_v57 = vadd.f32 %v2005_v56, %v1777_v55  ;;  %v528_v56 = vld [vmem:[%s2682_s28 + $0x58] sm:$0xff] }
 0x22e   : > { %v984_v58 = vpop.f32.mrf.mxu1  ;;  %2035 = vmatprep.subr.mxu0 %v528_v56 }
 0x22f   : > { %v985_v59 = vadd.f32 %v1777_v55, %v984_v58  ;;  %1065 = vmax.xlane.f32.xlu1 %v990_v57  ;;  %2036 = vmatpush3.msra.mxu0 %v528_v56 }
 0x231   : > { %1063 = vmax.xlane.f32.xlu0 %v985_v59 }
 0x234   : > { %v2008_v37 = vpop.f32.mrf.mxu1 }
 0x235   : > { %v1000_v60 = vadd.f32 %v2008_v37, %v1777_v55 }
 0x236   : > { %v994_v61 = vpop.f32.mrf.mxu1 }
 0x237   : > { %1069 = vmax.xlane.f32.xlu1 %v1000_v60  ;;  %v995_v62 = vadd.f32 %v1777_v55, %v994_v61  ;;  %v526_v61 = vld [vmem:[%s2682_s28 + $0x48] sm:$0xff] }
 0x23b   : > { %1067 = vmax.xlane.f32.xlu1 %v995_v62 }
 0x23c   : > { %v2011_v63 = vpop.f32.mrf.mxu1 }
 0x23d   : > { %v2642_v0 = vadd.f32 %v2011_v63, %v1777_v55 }
 0x23e   : > { %v1004_v1 = vpop.f32.mrf.mxu1 }
 0x23f   : > { %1073 = vmax.xlane.f32.xlu1 %v2642_v0  ;;  %v2645_v2 = vadd.f32 %v1777_v55, %v1004_v1 }
 0x243   : > { %1071 = vmax.xlane.f32.xlu1 %v2645_v2 }
 0x244   : > { %v2014_v3 = vpop.f32.mrf.mxu1 }
 0x245   : > { %v2648_v4 = vadd.f32 %v2014_v3, %v1777_v55  ;;  %v524_v3 = vld [vmem:[%s2682_s28 + $0x38] sm:$0xff] }
 0x246   : > { %v1014_v5 = vpop.f32.mrf.mxu1 }
 0x247   : > { %1077 = vmax.xlane.f32.xlu1 %v2648_v4  ;;  %v2651_v6 = vadd.f32 %v1777_v55, %v1014_v5 }
 0x24b   : > { %1075 = vmax.xlane.f32.xlu1 %v2651_v6 }
 0x24c   : > { %v2017_v7 = vpop.f32.mrf.mxu1 }
 0x24d   : > { %v2654_v8 = vadd.f32 %v2017_v7, %v1777_v55 }
 0x24e   : > { %v1024_v9 = vpop.f32.mrf.mxu1 }
 0x24f   : > { %1081 = vmax.xlane.f32.xlu1 %v2654_v8  ;;  %v2657_v10 = vadd.f32 %v1777_v55, %v1024_v9  ;;  %v522_v9 = vld [vmem:[%s2682_s28 + $0x28] sm:$0xff] }
 0x253   : > { %1079 = vmax.xlane.f32.xlu1 %v2657_v10 }
 0x254   : > { %v2020_v11 = vpop.f32.mrf.mxu1 }
 0x255   : > { %v2660_v12 = vadd.f32 %v2020_v11, %v1777_v55 }
 0x256   : > { %v1034_v13 = vpop.f32.mrf.mxu1 }
 0x257   : > { %1085 = vmax.xlane.f32.xlu1 %v2660_v12  ;;  %v2663_v14 = vadd.f32 %v1777_v55, %v1034_v13  ;;  %v521_v13 = vld [vmem:[%s2682_s28 + $0x20] sm:$0xff] }
 0x25b   : > { %1083 = vmax.xlane.f32.xlu1 %v2663_v14 }
 0x25c   : > { %v2023_v15 = vpop.f32.mrf.mxu1 }
 0x25d   : > { %v2666_v16 = vadd.f32 %v2023_v15, %v1777_v55 }
 0x25e   : > { %v1044_v17 = vpop.f32.mrf.mxu1 }
 0x25f   : > { %1089 = vmax.xlane.f32.xlu1 %v2666_v16  ;;  %v2669_v18 = vadd.f32 %v1777_v55, %v1044_v17  ;;  %v520_v17 = vld [vmem:[%s2682_s28 + $0x18] sm:$0xff] }
 0x263   : > { %1087 = vmax.xlane.f32.xlu1 %v2669_v18 }
 0x264   : > { %v2026_v19 = vpop.f32.mrf.mxu1 }
 0x265   : > { %v2675_v22 = vadd.f32 %v2026_v19, %v1777_v55 }
 0x266   : > { %v1054_v20 = vpop.f32.mrf.mxu1 }
 0x267   : > { %v2672_v21 = vadd.f32 %v1777_v55, %v1054_v20 }
 0x269   : > { %1091 = vmax.xlane.f32.xlu1 %v2672_v21 }
 0x26d   : > { %1093 = vmax.xlane.f32.xlu1 %v2675_v22 }
 0x2b8   : > { %v1066_v26 = vpop.xlane.xlu1 %1065 }
 0x2b9   : > { %v1096_v27 = vsub.f32 %v990_v57, %v1066_v26 }
 0x2ba   : > { %v1064_v28 = vpop.xlane.xlu0 %1063 }
 0x2bb   : > { %v1113_v29 = vmul.f32 1.442695, %v1096_v27  ;;  %v1095_v30 = vsub.f32 %v985_v59, %v1064_v28  ;;  %v527_v59 = vld [vmem:[%s2682_s28 + $0x50] sm:$0xff]  ;;  %v517_v28 = vld [vmem:[%s2682_s28] sm:$0xff] }
 0x2bc   : > { %2037 = vmatprep.subr.mxu0 %v527_v59 }
 0x2bd   : > { %2185 = vpow2.f32 %v1113_v29  ;;  %v1111_v31 = vmul.f32 1.442695, %v1095_v30  ;;  %2038 = vmatpush3.msra.mxu0 %v527_v59 }
 0x2be   : > { %2039 = vmatprep.subr.mxu0 %v526_v61 }
 0x2bf   : > { %2187 = vpow2.f32 %v1111_v31  ;;  %2040 = vmatpush3.msra.mxu0 %v526_v61 }
 0x2c0   : > { %v1070_v32 = vpop.xlane.xlu1 %1069 }
 0x2c1   : > { %v1098_v33 = vsub.f32 %v1000_v60, %v1070_v32 }
 0x2c3   : > { %v1117_v34 = vmul.f32 1.442695, %v1098_v33 }
 0x2c4   : > { %v1068_v35 = vpop.xlane.xlu1 %1067 }
 0x2c5   : > { %2189 = vpow2.f32 %v1117_v34  ;;  %v1097_v36 = vsub.f32 %v995_v62, %v1068_v35 }
 0x2c7   : > { %v1115_v38 = vmul.f32 1.442695, %v1097_v36 }
 0x2c8   : > { %v1074_v39 = vpop.xlane.xlu1 %1073 }
 0x2c9   : > { %2191 = vpow2.f32 %v1115_v38  ;;  %v1100_v40 = vsub.f32 %v2642_v0, %v1074_v39  ;;  %v525_v0 = vld [vmem:[%s2682_s28 + $0x40] sm:$0xff] }
 0x2ca   : > { %v2688_v41 = vpop.eup %2185  ;;  %2041 = vmatprep.subr.mxu0 %v525_v0 }
 0x2cb   : > { %v1121_v42 = vmul.f32 1.442695, %v1100_v40  ;;  %1145 = vadd.xlane.f32.xlu1 %v2688_v41  ;;  %2042 = vmatpush3.msra.mxu0 %v525_v0 }
 0x2cc   : > { %v1072_v43 = vpop.xlane.xlu1 %1071  ;;  %v2692_v45 = vpop.eup %2187  ;;  %2043 = vmatprep.subr.mxu0 %v524_v3 }
 0x2cd   : > { %2193 = vpow2.f32 %v1121_v42  ;;  %v1099_v44 = vsub.f32 %v2645_v2, %v1072_v43  ;;  %2044 = vmatpush3.msra.mxu0 %v524_v3 }
 0x2cf   : > { %v1119_v46 = vmul.f32 1.442695, %v1099_v44  ;;  %1143 = vadd.xlane.f32.xlu1 %v2692_v45 }
 0x2d0   : > { %v1078_v47 = vpop.xlane.xlu1 %1077 }
 0x2d1   : > { %2195 = vpow2.f32 %v1119_v46  ;;  %v1102_v48 = vsub.f32 %v2648_v4, %v1078_v47 }
 0x2d2   : > { %v2696_v49 = vpop.eup %2189 }
 0x2d3   : > { %v1125_v50 = vmul.f32 1.442695, %v1102_v48  ;;  %1149 = vadd.xlane.f32.xlu1 %v2696_v49 }
 0x2d4   : > { %v1076_v51 = vpop.xlane.xlu1 %1075 }
 0x2d5   : > { %2197 = vpow2.f32 %v1125_v50  ;;  %v1101_v52 = vsub.f32 %v2651_v6, %v1076_v51  ;;  %v523_v6 = vld [vmem:[%s2682_s28 + $0x30] sm:$0xff] }
 0x2d6   : > { %v2701_v54 = vpop.eup %2191  ;;  %2045 = vmatprep.subr.mxu0 %v523_v6 }
 0x2d7   : > { %v1123_v55 = vmul.f32 1.442695, %v1101_v52  ;;  %1147 = vadd.xlane.f32.xlu1 %v2701_v54  ;;  %2046 = vmatpush3.msra.mxu0 %v523_v6 }
 0x2d8   : > { %v1082_v57 = vpop.xlane.xlu1 %1081  ;;  %2047 = vmatprep.subr.mxu0 %v522_v9 }
 0x2d9   : > { %2199 = vpow2.f32 %v1123_v55  ;;  %v1104_v58 = vsub.f32 %v2654_v8, %v1082_v57  ;;  %2048 = vmatpush3.msra.mxu0 %v522_v9 }
 0x2da   : > { %v2707_v37 = vpop.eup %2193  ;;  %2049 = vmatprep.subr.mxu0 %v521_v13 }
 0x2db   : > { %v1129_v60 = vmul.f32 1.442695, %v1104_v58  ;;  %1153 = vadd.xlane.f32.xlu1 %v2707_v37  ;;  %2050 = vmatpush3.msra.mxu0 %v521_v13 }
 0x2dc   : > { %v1080_v62 = vpop.xlane.xlu1 %1079  ;;  %2051 = vmatprep.subr.mxu0 %v520_v17 }
 0x2dd   : > { %2201 = vpow2.f32 %v1129_v60  ;;  %v1103_v63 = vsub.f32 %v2657_v10, %v1080_v62  ;;  %2052 = vmatpush3.msra.mxu0 %v520_v17 }
 0x2de   : > { %v2713_v1 = vpop.eup %2195  ;;  %2053 = vmatprep.subr.mxu0 %v519_v23 }
 0x2df   : > { %v1127_v2 = vmul.f32 1.442695, %v1103_v63  ;;  %1151 = vadd.xlane.f32.xlu1 %v2713_v1  ;;  %2054 = vmatpush3.msra.mxu0 %v519_v23 }
 0x2e0   : > { %v1086_v4 = vpop.xlane.xlu1 %1085  ;;  %2055 = vmatprep.subr.mxu0 %v518_v25 }
 0x2e1   : > { %2203 = vpow2.f32 %v1127_v2  ;;  %v1106_v5 = vsub.f32 %v2660_v12, %v1086_v4  ;;  %2056 = vmatpush3.msra.mxu0 %v518_v25 }
 0x2e2   : > { %v2719_v7 = vpop.eup %2197  ;;  %2057 = vmatprep.subr.mxu0 %v517_v28 }
 0x2e3   : > { %v1133_v8 = vmul.f32 1.442695, %v1106_v5  ;;  %1157 = vadd.xlane.f32.xlu1 %v2719_v7  ;;  %2058 = vmatpush3.msra.mxu0 %v517_v28 }
 0x2e4   : > { %v1084_v10 = vpop.xlane.xlu1 %1083 }
 0x2e5   : > { %2205 = vpow2.f32 %v1133_v8  ;;  %v1105_v11 = vsub.f32 %v2663_v14, %v1084_v10 }
 0x2e6   : > { %v2725_v12 = vpop.eup %2199 }
 0x2e7   : > { %v1131_v15 = vmul.f32 1.442695, %v1105_v11  ;;  %1155 = vadd.xlane.f32.xlu1 %v2725_v12 }
 0x2e8   : > { %v1090_v19 = vpop.xlane.xlu1 %1089 }
 0x2e9   : > { %2207 = vpow2.f32 %v1131_v15  ;;  %v1108_v20 = vsub.f32 %v2666_v16, %v1090_v19 }
 0x2ea   : > { %v2731_v14 = vpop.eup %2201 }
 0x2eb   : > { %v1137_v24 = vmul.f32 1.442695, %v1108_v20  ;;  %1161 = vadd.xlane.f32.xlu1 %v2731_v14 }
 0x2ec   : > { %v1088_v26 = vpop.xlane.xlu1 %1087 }
 0x2ed   : > { %2209 = vpow2.f32 %v1137_v24  ;;  %v1107_v27 = vsub.f32 %v2669_v18, %v1088_v26 }
 0x2ee   : > { %v2737_v29 = vpop.eup %2203 }
 0x2ef   : > { %v1135_v16 = vmul.f32 1.442695, %v1107_v27  ;;  %1159 = vadd.xlane.f32.xlu1 %v2737_v29 }
 0x2f1   : > { %2211 = vpow2.f32 %v1135_v16 }
 0x2f2   : > { %v2740_v30 = vpop.eup %2205  ;;  %v1092_v31 = vpop.xlane.xlu1 %1091 }
 0x2f3   : > { %v1109_v32 = vsub.f32 %v2672_v21, %v1092_v31  ;;  %1165 = vadd.xlane.f32.xlu1 %v2740_v30 }
 0x2f5   : > { %v1139_v33 = vmul.f32 1.442695, %v1109_v32 }
 0x2f6   : > { %v2744_v34 = vpop.eup %2207  ;;  %v1094_v18 = vpop.xlane.xlu1 %1093 }
 0x2f7   : > { %2213 = vpow2.f32 %v1139_v33  ;;  %v1110_v35 = vsub.f32 %v2675_v22, %v1094_v18  ;;  %1163 = vadd.xlane.f32.xlu1 %v2744_v34 }
 0x2f9   : > { %v1141_v36 = vmul.f32 1.442695, %v1110_v35 }
 0x2fa   : > { %v2748_v38 = vpop.eup %2209 }
 0x2fb   : > { %2215 = vpow2.f32 %v1141_v36  ;;  %1169 = vadd.xlane.f32.xlu0 %v2748_v38 }
 0x2fe   : > { %v2751_v39 = vpop.eup %2211 }
 0x2ff   : > { %1167 = vadd.xlane.f32.xlu1 %v2751_v39 }
 0x304   : > { %v2754_v21 = vpop.eup %2213 }
 0x305   : > { %1171 = vadd.xlane.f32.xlu1 %v2754_v21 }
 0x308   : > { %v2757_v40 = vpop.eup %2215 }
 0x309   : > { %1173 = vadd.xlane.f32.xlu0 %v2757_v40 }
 0x354   : > { %v1146_v22 = vpop.xlane.xlu1 %1145 }
 0x355   : > { %2217 = vrcp.f32 %v1146_v22 }
 0x358   : > { %v1144_v42 = vpop.xlane.xlu1 %1143 }
 0x359   : > { %2219 = vrcp.f32 %v1144_v42 }
 0x35c   : > { %v1150_v43 = vpop.xlane.xlu1 %1149 }
 0x35d   : > { %2221 = vrcp.f32 %v1150_v43 }
 0x360   : > { %v1148_v44 = vpop.xlane.xlu1 %1147 }
 0x361   : > { %2223 = vrcp.f32 %v1148_v44 }
 0x362   : > { %v2218_v46 = vpop.eup %2217 }
 0x363   : > { %v1192_v47 = vmul.f32 %v2218_v46, %v1146_v22 }
 0x364   : > { %v1154_v48 = vpop.xlane.xlu1 %1153 }
 0x365   : > { %v1208_v50 = vsub.f32 2.0, %v1192_v47  ;;  %2225 = vrcp.f32 %v1154_v48 }
 0x366   : > { %v2220_v51 = vpop.eup %2219 }
 0x367   : > { %v1224_v52 = vmul.f32 %v2218_v46, %v1208_v50  ;;  %v1191_v53 = vmul.f32 %v2220_v51, %v1144_v42 }
 0x368   : > { %v1152_v55 = vpop.xlane.xlu1 %1151 }
 0x369   : > { %v1207_v56 = vsub.f32 2.0, %v1191_v53  ;;  %2227 = vrcp.f32 %v1152_v55  ;;  %v1240_v57 = vmul.f32 %v2688_v41, %v1224_v52 }
 0x36a   : > { %v2222_v58 = vpop.eup %2221 }
 0x36b   : > { %v1194_v59 = vmul.f32 %v2222_v58, %v1150_v43  ;;  %v1223_v60 = vmul.f32 %v2220_v51, %v1207_v56  ;;  %1256 = vst [vmem:[%s2765_s12 + $0x8] sm:$0xff] %v1240_v57 }
 0x36c   : > { %v1158_v61 = vpop.xlane.xlu1 %1157 }
 0x36d   : > { %v1210_v62 = vsub.f32 2.0, %v1194_v59  ;;  %2229 = vrcp.f32 %v1158_v61  ;;  %v1239_v63 = vmul.f32 %v2692_v45, %v1223_v60 }
 0x36e   : > { %v2224_v0 = vpop.eup %2223 }
 0x36f   : > { %v1226_v2 = vmul.f32 %v2222_v58, %v1210_v62  ;;  %v1193_v3 = vmul.f32 %v2224_v0, %v1148_v44  ;;  %1255 = vst [vmem:[%s2765_s12] sm:$0xff] %v1239_v63  ;;  %2059 = vmatprep.mubr.f32.mxu0 %v1239_v63 }
 0x370   : > { %2060 = vmatmul.mubr.f32.vlgmr.msra.gmra.mxu0 %v1240_v57  ;;  %v1156_v41 = vpop.xlane.xlu1 %1155 }
 0x371   : > { %v1209_v4 = vsub.f32 2.0, %v1193_v3  ;;  %2231 = vrcp.f32 %v1156_v41  ;;  %v1242_v5 = vmul.f32 %v2696_v49, %v1226_v2 }
 0x372   : > { %v2226_v6 = vpop.eup %2225 }
 0x373   : > { %v1225_v8 = vmul.f32 %v2224_v0, %v1209_v4  ;;  %v1196_v9 = vmul.f32 %v2226_v6, %v1154_v48  ;;  %1258 = vst [vmem:[%s2765_s12 + $0x18] sm:$0xff] %v1242_v5 }
 0x374   : > { %v1162_v10 = vpop.xlane.xlu1 %1161 }
 0x375   : > { %v1212_v11 = vsub.f32 2.0, %v1196_v9  ;;  %2233 = vrcp.f32 %v1162_v10  ;;  %v1241_v45 = vmul.f32 %v2701_v54, %v1225_v8 }
 0x376   : > { %v2228_v13 = vpop.eup %2227 }
 0x377   : > { %v1228_v15 = vmul.f32 %v2226_v6, %v1212_v11  ;;  %v1195_v17 = vmul.f32 %v2228_v13, %v1152_v55  ;;  %1257 = vst [vmem:[%s2765_s12 + $0x10] sm:$0xff] %v1241_v45  ;;  %2062 = vmatprep.mubr.f32.mxu0 %v1241_v45 }
 0x378   : > { %2063 = vmatmul.mubr.f32.gmra.mxu0 %v1242_v5  ;;  %v1160_v19 = vpop.xlane.xlu1 %1159 }
 0x379   : > { %v1211_v20 = vsub.f32 2.0, %v1195_v17  ;;  %2235 = vrcp.f32 %v1160_v19  ;;  %v1244_v49 = vmul.f32 %v2707_v37, %v1228_v15 }
 0x37a   : > { %v2230_v23 = vpop.eup %2229 }
 0x37b   : > { %v1227_v24 = vmul.f32 %v2228_v13, %v1211_v20  ;;  %v1198_v25 = vmul.f32 %v2230_v23, %v1158_v61  ;;  %1260 = vst [vmem:[%s2765_s12 + $0x28] sm:$0xff] %v1244_v49  ;;  %v2360_v20 = vmov 0  }
 0x37c   : > { %v1166_v26 = vpop.xlane.xlu1 %1165  ;;  %2183 = vset.pattern.permute.xlu1 %v2360_v20  ;;  %2184 = vset.pattern.permute.xlu0 %v2360_v20 }
 0x37d   : > { %v1214_v27 = vsub.f32 2.0, %v1198_v25  ;;  %2237 = vrcp.f32 %v1166_v26  ;;  %v1243_v54 = vmul.f32 %v2713_v1, %v1227_v24 }
 0x37e   : > { %v2232_v28 = vpop.eup %2231 }
 0x37f   : > { %v1230_v16 = vmul.f32 %v2230_v23, %v1214_v27  ;;  %v1197_v31 = vmul.f32 %v2232_v28, %v1156_v41  ;;  %1259 = vst [vmem:[%s2765_s12 + $0x20] sm:$0xff] %v1243_v54  ;;  %2065 = vmatprep.mubr.f32.mxu0 %v1243_v54 }
 0x380   : > { %2066 = vmatmul.mubr.f32.gmra.mxu0 %v1244_v49  ;;  %v1164_v32 = vpop.xlane.xlu1 %1163 }
 0x381   : > { %v1213_v33 = vsub.f32 2.0, %v1197_v31  ;;  %2239 = vrcp.f32 %v1164_v32  ;;  %v1246_v37 = vmul.f32 %v2719_v7, %v1230_v16 }
 0x382   : > { %v2234_v18 = vpop.eup %2233 }
 0x383   : > { %v1229_v35 = vmul.f32 %v2232_v28, %v1213_v33  ;;  %v1200_v36 = vmul.f32 %v2234_v18, %v1162_v10  ;;  %1262 = vst [vmem:[%s2765_s12 + $0x38] sm:$0xff] %v1246_v37 }
 0x384   : > { %v1170_v22 = vpop.xlane.xlu0 %1169 }
 0x385   : > { %v1216_v42 = vsub.f32 2.0, %v1200_v36  ;;  %2241 = vrcp.f32 %v1170_v22  ;;  %v1245_v1 = vmul.f32 %v2725_v12, %v1229_v35  ;;  %v1416_v35 = vld [vmem:[%s2901_s7] sm:$0xff] }
 0x386   : > { %v2236_v43 = vpop.eup %2235 }
 0x387   : > { %v1232_v44 = vmul.f32 %v2234_v18, %v1216_v42  ;;  %v1199_v46 = vmul.f32 %v2236_v43, %v1160_v19  ;;  %1261 = vst [vmem:[%s2765_s12 + $0x30] sm:$0xff] %v1245_v1  ;;  %2068 = vmatprep.mubr.f32.mxu0 %v1245_v1  ;;  %v2358_v19 = vmov 0.0  }
 0x388   : > { %2069 = vmatmul.mubr.f32.gmra.mxu0 %v1246_v37  ;;  %v1168_v47 = vpop.xlane.xlu1 %1167  ;;  %2083 = vmatprep.subr.mxu0 %v2358_v19 }
 0x389   : > { %v1215_v48 = vsub.f32 2.0, %v1199_v46  ;;  %2243 = vrcp.f32 %v1168_v47  ;;  %v1248_v7 = vmul.f32 %v2731_v14, %v1232_v44 }
 0x38a   : > { %v2238_v50 = vpop.eup %2237 }
 0x38b   : > { %v1231_v51 = vmul.f32 %v2236_v43, %v1215_v48  ;;  %v1202_v52 = vmul.f32 %v2238_v50, %v1166_v26  ;;  %1264 = vst [vmem:[%s2765_s12 + $0x48] sm:$0xff] %v1248_v7 }
 0x38d   : > { %v1218_v53 = vsub.f32 2.0, %v1202_v52  ;;  %v1247_v55 = vmul.f32 %v2737_v29, %v1231_v51 }
 0x38e   : > { %v2240_v12 = vpop.eup %2239  ;;  %v1172_v56 = vpop.xlane.xlu1 %1171 }
 0x38f   : > { %v1234_v57 = vmul.f32 %v2238_v50, %v1218_v53  ;;  %v1201_v58 = vmul.f32 %v2240_v12, %v1164_v32  ;;  %2245 = vrcp.f32 %v1172_v56  ;;  %1263 = vst [vmem:[%s2765_s12 + $0x40] sm:$0xff] %v1247_v55  ;;  %2071 = vmatprep.mubr.f32.mxu0 %v1247_v55 }
 0x390   : > { %2072 = vmatmul.mubr.f32.gmra.mxu0 %v1248_v7 }
 0x391   : > { %v1217_v59 = vsub.f32 2.0, %v1201_v58  ;;  %v1250_v14 = vmul.f32 %v2740_v30, %v1234_v57 }
 0x392   : > { %v2242_v60 = vpop.eup %2241  ;;  %v1174_v61 = vpop.xlane.xlu0 %1173 }
 0x393   : > { %v1233_v62 = vmul.f32 %v2240_v12, %v1217_v59  ;;  %v1204_v63 = vmul.f32 %v2242_v60, %v1170_v22  ;;  %2247 = vrcp.f32 %v1174_v61  ;;  %1266 = vst [vmem:[%s2765_s12 + $0x58] sm:$0xff] %v1250_v14 }
 0x395   : > { %v1220_v29 = vsub.f32 2.0, %v1204_v63  ;;  %v1249_v0 = vmul.f32 %v2744_v34, %v1233_v62 }
 0x396   : > { %v2244_v2 = vpop.eup %2243 }
 0x397   : > { %v1236_v3 = vmul.f32 %v2242_v60, %v1220_v29  ;;  %v1203_v41 = vmul.f32 %v2244_v2, %v1168_v47  ;;  %1265 = vst [vmem:[%s2765_s12 + $0x50] sm:$0xff] %v1249_v0  ;;  %2074 = vmatprep.mubr.f32.mxu0 %v1249_v0 }
 0x398   : > { %2075 = vmatmul.mubr.f32.gmra.mxu0 %v1250_v14 }
 0x399   : > { %v1219_v4 = vsub.f32 2.0, %v1203_v41  ;;  %v1252_v30 = vmul.f32 %v2748_v38, %v1236_v3 }
 0x39b   : > { %v1235_v5 = vmul.f32 %v2244_v2, %v1219_v4  ;;  %1268 = vst [vmem:[%s2765_s12 + $0x68] sm:$0xff] %v1252_v30 }
 0x39c   : > { %v2246_v6 = vpop.eup %2245 }
 0x39d   : > { %v1205_v8 = vmul.f32 %v2246_v6, %v1172_v56  ;;  %v1251_v9 = vmul.f32 %v2751_v39, %v1235_v5  ;;  %v1417_v39 = vld [vmem:[%s2902_s8] sm:$0xff] }
 0x39e   : > { %1420 = vperm.xlu1 %2183, %v1417_v39  }
 0x39f   : > { %v1221_v10 = vsub.f32 2.0, %v1205_v8  ;;  %1267 = vst [vmem:[%s2765_s12 + $0x60] sm:$0xff] %v1251_v9  ;;  %2077 = vmatprep.mubr.f32.mxu0 %v1251_v9 }
 0x3a0   : > { %v2248_v34 = vpop.eup %2247  ;;  %2078 = vmatmul.mubr.f32.gmra.mxu0 %v1252_v30 }
 0x3a1   : > { %v1237_v11 = vmul.f32 %v2246_v6, %v1221_v10  ;;  %v1206_v45 = vmul.f32 %v2248_v34, %v1174_v61 }
 0x3a3   : > { %v1222_v13 = vsub.f32 2.0, %v1206_v45  ;;  %v1253_v15 = vmul.f32 %v2754_v21, %v1237_v11 }
 0x3a5   : > { %v1238_v17 = vmul.f32 %v2248_v34, %v1222_v13  ;;  %1269 = vst [vmem:[%s2765_s12 + $0x70] sm:$0xff] %v1253_v15  ;;  %2080 = vmatprep.mubr.f32.mxu0 %v1253_v15 }
 0x3a7   : > { %v1254_v38 = vmul.f32 %v2757_v40, %v1238_v17 }
 0x3a9   : > { %1270 = vst [vmem:[%s2765_s12 + $0x78] sm:$0xff] %v1254_v38  ;;  %2081 = vmatmul.mubr.f32.gmra.mxu0 %v1254_v38 }
 0x3aa   : > { %2115 = vmatprep.mubr.msk.f32.mxu0 %vm2359_vm2, %v2358_v19 }
 0x430   : > { %v2061_v21 = vpop.f32.mrf.mxu0 }
 0x432   : > { %v1337_v49 = vpop.f32.mrf.mxu0 }
 0x438   : > { %v2064_v23 = vpop.f32.mrf.mxu0 }
 0x43a   : > { %v1347_v24 = vpop.f32.mrf.mxu0 }
 0x440   : > { %v2067_v25 = vpop.f32.mrf.mxu0 }
 0x442   : > { %v1357_v40 = vpop.f32.mrf.mxu0 }
 0x448   : > { %v2070_v26 = vpop.f32.mrf.mxu0 }
 0x44a   : > { %v1367_v27 = vpop.f32.mrf.mxu0 }
 0x450   : > { %v2073_v54 = vpop.f32.mrf.mxu0 }
 0x452   : > { %v1377_v28 = vpop.f32.mrf.mxu0 }
 0x458   : > { %v2076_v16 = vpop.f32.mrf.mxu0 }
 0x45a   : > { %v1387_v31 = vpop.f32.mrf.mxu0 }
 0x460   : > { %v2079_v32 = vpop.f32.mrf.mxu0 }
 0x462   : > { %v1397_v33 = vpop.f32.mrf.mxu0 }
 0x469   : > { %v2082_v37 = vpop.f32.mrf.mxu0 }
 0x46a   : > { %2084 = vmatpush3.xpose.msk.msra.mxu0 %vm821_vm1, %v2082_v37 }
 0x46b   : > { %2085 = vmatprep.subr.mxu0 %v2358_v19  ;;  %v1407_v18 = vpop.f32.mrf.mxu0 }
 0x46e   : > { %2086 = vmatpush3.xpose.msk.msra.mxu0 %vm821_vm1, %v1407_v18 }
 0x46f   : > { %2087 = vmatprep.subr.mxu0 %v2358_v19 }
 0x472   : > { %2088 = vmatpush3.xpose.msk.msra.mxu0 %vm821_vm1, %v2079_v32 }
 0x473   : > { %2089 = vmatprep.subr.mxu0 %v2358_v19 }
 0x476   : > { %2090 = vmatpush3.xpose.msk.msra.mxu0 %vm821_vm1, %v1397_v33 }
 0x477   : > { %2091 = vmatprep.subr.mxu0 %v2358_v19 }
 0x47a   : > { %2092 = vmatpush3.xpose.msk.msra.mxu0 %vm821_vm1, %v2076_v16 }
 0x47b   : > { %2093 = vmatprep.subr.mxu0 %v2358_v19 }
 0x47e   : > { %2094 = vmatpush3.xpose.msk.msra.mxu0 %vm821_vm1, %v1387_v31 }
 0x47f   : > { %2095 = vmatprep.subr.mxu0 %v2358_v19 }
 0x482   : > { %2096 = vmatpush3.xpose.msk.msra.mxu0 %vm821_vm1, %v2073_v54 }
 0x483   : > { %2097 = vmatprep.subr.mxu0 %v2358_v19 }
 0x486   : > { %2098 = vmatpush3.xpose.msk.msra.mxu0 %vm821_vm1, %v1377_v28 }
 0x487   : > { %2099 = vmatprep.subr.mxu0 %v2358_v19 }
 0x48a   : > { %2100 = vmatpush3.xpose.msk.msra.mxu0 %vm821_vm1, %v2070_v26 }
 0x48b   : > { %2101 = vmatprep.subr.mxu0 %v2358_v19 }
 0x48e   : > { %2102 = vmatpush3.xpose.msk.msra.mxu0 %vm821_vm1, %v1367_v27 }
 0x48f   : > { %2103 = vmatprep.subr.mxu0 %v2358_v19 }
 0x492   : > { %2104 = vmatpush3.xpose.msk.msra.mxu0 %vm821_vm1, %v2067_v25 }
 0x493   : > { %2105 = vmatprep.subr.mxu0 %v2358_v19 }
 0x496   : > { %2106 = vmatpush3.xpose.msk.msra.mxu0 %vm821_vm1, %v1357_v40 }
 0x497   : > { %2107 = vmatprep.subr.mxu0 %v2358_v19 }
 0x49a   : > { %2108 = vmatpush3.xpose.msk.msra.mxu0 %vm821_vm1, %v2064_v23 }
 0x49b   : > { %2109 = vmatprep.subr.mxu0 %v2358_v19 }
 0x49e   : > { %2110 = vmatpush3.xpose.msk.msra.mxu0 %vm821_vm1, %v1347_v24 }
 0x49f   : > { %2111 = vmatprep.subr.mxu0 %v2358_v19 }
 0x4a2   : > { %2112 = vmatpush3.xpose.msk.msra.mxu0 %vm821_vm1, %v2061_v21 }
 0x4a3   : > { %2113 = vmatprep.subr.mxu0 %v2358_v19 }
 0x4a6   : > { %2114 = vmatpush3.xpose.msk.msra.mxu0 %vm821_vm1, %v1337_v49 }
 0x4a9   : > { %2116 = vmatmul.mubr.msk.f32.vlgmr.msra.gmra.mxu0 %vm821_vm1, %v1416_v35 }
 0x4aa   : > { %2263 = shalt.err (!%p2260_p5)
}
 0x4ab   : > { %s2264_s12 = scalar_lea.hbm %s2825_s19, 2048  ;;  %s2268_s29 = scalar_lea.hbm %s2904_s10, 4096 }
 0x4ac   : > { %p2265_p6 = scmp.ne.s32.totalorder %s2825_s19, %s2264_s12  ;;  %p2269_p10 = scmp.lt.s32.totalorder %s2825_s19, %s2904_s10 }
 0x4ad   : > { %p2270_p11 = scmp.lt.s32.totalorder %s2268_s29, %s2264_s12 }
 0x4ae   : > { %p2266_p7 = pnand %p2265_p6, %p2460_p4 }
 0x4af   : > { %p2271_p12 = por %p2270_p11, %p2269_p10 }
 0x4b0   : > { %p2267_p9 = pneg %p2266_p7 }
 0x4b2   : > { %p2272_p13 = pnand %p2271_p12, %p2267_p9 }
 0x4b4   : > { %2275 = shalt.err (!%p2272_p13)
}
 0x4b5   : > { %s2362_s1 = smov 128   ;;  %s2363_s2 = smov 8   ;;  %v1421_v36 = vpop.permute.xlu1 %1420  ;;  %v2249_v43 = vld [vmem:[%s2495_s27] sm:$0xff] }
 0x4b6   : > { %s2917_s11 = scalar_lea.sflag [#allocation5], %s2761_s30  ;;  %s1747_s24 = sshll.u32 %s2761_s30, 3 }
 0x4b7   : > { %2119 = dma.vmem_to_hbm [thread:$0]  (%p2460_p4), %s2828_s20, 2048, %s2825_s19, %s2917_s11, %s2362_s1, %s2362_s1, %s2363_s2  }
 0x4b8   : > { %s1829_s0 = sshll.u32 %s2348_s16, 7  ;;  %s445_s12 = scalar_lea.vmem [#allocation2], %s1747_s24 }
 0x4b9   : > { %s1567_s28 = sshll.u32 %s445_s12, 4  ;;  %s1565_s3 = scalar_lea.hbm %s2903_s9, %s1829_s0  ;;  %s1568_s28 = int_to_ptr.vmem [resolvable:$true] %s1567_s28 }
 0x4ba   : > { %s1548_s4 = scalar_lea.sflag [#allocation3], %s2761_s30  ;;  %s2276_s19 = scalar_lea.vmem %s1568_s28, 128 }
 0x4bb   : > { %p2277_p0 = scmp.ne.s32.totalorder %s1568_s28, %s2276_s19  ;;  %s2364_s20 = smov [#allocation2]  }
 0x4bc   : > { %s2280_s1 = sshll.u32 %s2364_s20, 4  ;;  %s2281_s1 = int_to_ptr.vmem [resolvable:$false] %s2280_s1 }
 0x4bd   : > { %p2278_p1 = pnand %p2277_p0, %p2460_p4  ;;  %s2282_s16 = scalar_lea.vmem %s2281_s1, 256 }
 0x4be   : > { %p2283_p3 = scmp.lt.s32.totalorder %s1568_s28, %s2281_s1  ;;  %p2284_p5 = scmp.lt.s32.totalorder %s2282_s16, %s2276_s19 }
 0x4bf   : > { %p2279_p2 = pneg %p2278_p1 }
 0x4c0   : > { %p2285_p6 = por %p2284_p5, %p2283_p3 }
 0x4c2   : > { %p2286_p7 = pnand %p2285_p6, %p2279_p2 }
 0x569   : > { %v1540_v22 = vpop.f32.mrf.mxu0 }
 0x56a   : > { %v1541_v42 = vadd.f32 %v1540_v22, %v1421_v36 }
 0x56b   : > { %v2117_v1 = vpop.f32.mrf.mxu0 }
 0x56c   : > { %v1544_v44 = vadd.f32 %v2249_v43, %v1541_v42 }
 0x56e   : > { %v1545_v46 = vmul.f32 0.70710677, %v1544_v44 }
 0x570   : > { %1546 = vst [vmem:[%s445_s12] sm:$0xff] %v1545_v46 }
 0x571   : > { %2289 = shalt.err (!%p2286_p7)
}
 0x572   : > { %s2290_s27 = scalar_lea.hbm %s1565_s3, 128  ;;  %s2294_s11 = scalar_lea.hbm %s2903_s9, 256 }
 0x573   : > { %p2291_p9 = scmp.ne.s32.totalorder %s1565_s3, %s2290_s27  ;;  %p2295_p12 = scmp.lt.s32.totalorder %s1565_s3, %s2903_s9 }
 0x574   : > { %p2296_p13 = scmp.lt.s32.totalorder %s2294_s11, %s2290_s27 }
 0x575   : > { %p2292_p10 = pnand %p2291_p9, %p2460_p4 }
 0x576   : > { %p2297_p0 = por %p2296_p13, %p2295_p12 }
 0x577   : > { %p2293_p11 = pneg %p2292_p10 }
 0x579   : > { %p2298_p1 = pnand %p2297_p0, %p2293_p11 }
 0x57b   : > { %2301 = shalt.err (!%p2298_p1)
}
 0x57c   : > { %2118 = dma.vmem_to_hbm [thread:$0]  (%p2460_p4), %s1568_s28, 128, %s1565_s3, %s1548_s4  }
 0x57d PF: > { %p2129_p2 = scmp.ge.s32.totalorder %s2356_s18, 2  ;;  %s1597_s12 = sand.u32 1, %s2336_s13  }
 0x57e   : > { %s1598_s29 = scalar_lea.sflag [#allocation3], %s1597_s12 }
 0x57f   : > { %p2123_p3 = pnand %p2129_p2, %p2467_p8 }
 0x581   : > { %p2124_p5 = pneg %p2123_p3 }
 0x583   : > { %2327 = dma.done.wait (%p2124_p5), %s1598_s29, 128  }
 0x584   : > { %2329 = vsyncadd (%p2124_p5), %s1598_s29, 4294967168  ;;  %s1607_s22 = scalar_lea.sflag [#allocation5], %s1597_s12 }
 0x585   : > { %2331 = dma.done.wait (%p2124_p5), %s1607_s22, 2048  }
 0x586   : > { %2333 = vsyncadd (%p2124_p5), %s1607_s22, 4294965248  ;;  %s27_s18 = sadd.s32 1, %s2356_s18   ;;  %s2918_s13 = smov %s2340_s14 }
 0x587   : > { %p24_p6 = scmp.ge.s32.totalorder %s27_s18, 4   ;;  %s2919_s14 = smov %s2344_s15 }
 0x588   : > { %s2920_s15 = smov %s2473_s26  ;;  %s2921_s16 = smov %s2352_s17 }
 0x589   : > { %s2922_s17 = smov %s2924_s21  ;;  %26 = sbr.rel (!%p24_p6) target bundleno = 12 (0xc), region = 120 }
 0x58e   :  { %1612 = vsyncpa [#allocation3], 1 }
 0x58f   :  { %1614 = vsyncpa [#allocation3 + $0x1], 1 }
 0x590   :  { %1615 = vsyncpa [#allocation5], 1 }
 0x591   :  { %1617 = vsyncpa [#allocation5 + $0x1], 1 }

</bundles_post_ra>
